<compile_context>
chip_gen: v7x
topology: tpu7x:2x2x1
jax: 0.10.0
libtpu: 0.0.40
codegen_flags: <defaults>
</compile_context>

<pallas_src>
import jax
import jax.numpy as jnp
from jax.experimental import pallas as pl
from jax.experimental.pallas import tpu as pltpu


def _tv_kernel(x_ref, h_out_ref, w_out_ref):
    # x_ref:     (TB, H, W) block of flattened (batch, channel) spatial slices
    # h_out_ref: (1, 8, 128) per-block partial sum of squared vertical diffs
    # w_out_ref: (1, 8, 128) per-block partial sum of squared horizontal diffs
    x = x_ref[...]
    _, h, w = x.shape

    if h > 1:
        dh = (x[:, 1:, :] - x[:, :-1, :]).astype(jnp.float32)
        h_sum = jnp.sum(dh * dh)
    else:
        h_sum = jnp.float32(0.0)

    if w > 1:
        dw = (x[:, :, 1:] - x[:, :, :-1]).astype(jnp.float32)
        w_sum = jnp.sum(dw * dw)
    else:
        w_sum = jnp.float32(0.0)

    # Broadcast the per-block scalars into the aligned (8, 128) output tiles;
    # the wrapper reads element [0, 0] of each block.
    h_out_ref[...] = jnp.full(h_out_ref.shape, h_sum, dtype=jnp.float32)
    w_out_ref[...] = jnp.full(w_out_ref.shape, w_sum, dtype=jnp.float32)


def tv_loss(x, tv_loss_weight=1.0):
    """Total variation loss, identical semantics to the PyTorch TVLoss.forward."""
    b, c, h, w = x.shape
    bc = b * c
    x_flat = x.reshape(bc, h, w)

    # Block over the flattened (b, c) axis: ~1 MiB of f32 per grid step.
    slice_bytes = h * w * 4
    tb = max(1, (1 << 20) // slice_bytes)
    tb = min(tb, bc)
    num_blocks = -(-bc // tb)                    # cdiv
    bc_pad = num_blocks * tb
    if bc_pad != bc:
        # Zero-padded slices contribute exactly 0 to both sums.
        x_flat = jnp.pad(x_flat, ((0, bc_pad - bc), (0, 0), (0, 0)))

    h_parts, w_parts = pl.pallas_call(
        _tv_kernel,
        out_shape=(
            jax.ShapeDtypeStruct((num_blocks, 8, 128), jnp.float32),
            jax.ShapeDtypeStruct((num_blocks, 8, 128), jnp.float32),
        ),
        grid_spec=pltpu.PrefetchScalarGridSpec(
            num_scalar_prefetch=0,
            grid=(num_blocks,),
            in_specs=[pl.BlockSpec((tb, h, w), lambda i: (i, 0, 0))],
            out_specs=(
                pl.BlockSpec((1, 8, 128), lambda i: (i, 0, 0)),
                pl.BlockSpec((1, 8, 128), lambda i: (i, 0, 0)),
            ),
        ),
        compiler_params=pltpu.CompilerParams(
            dimension_semantics=("parallel",),
        ),
    )(x_flat)

    h_tv = jnp.sum(h_parts[:, 0, 0])
    w_tv = jnp.sum(w_parts[:, 0, 0])

    count_h = c * (h - 1) * w
    count_w = c * h * (w - 1)
    return tv_loss_weight * 2.0 * (h_tv / count_h + w_tv / count_w) / b


if __name__ == "__main__":
    key = jax.random.PRNGKey(0)
    x = jax.random.normal(key, (2, 4, 16, 16), dtype=jnp.float32)

    out = tv_loss(x, tv_loss_weight=1.0)
    jax.block_until_ready(out)

    # Reference (plain JAX), same math as the PyTorch module.
    b, c, h, w = x.shape
    dh = x[:, :, 1:, :] - x[:, :, :-1, :]
    dw = x[:, :, :, 1:] - x[:, :, :, :-1]
    count_h = c * (h - 1) * w
    count_w = c * h * (w - 1)
    ref = 1.0 * 2.0 * (jnp.sum(dh * dh) / count_h + jnp.sum(dw * dw) / count_w) / b
    assert jnp.allclose(out, ref, rtol=1e-5, atol=1e-5), (out, ref)

    print("KERNEL_OK")
</pallas_src>

<mosaic_0001>
module attributes {stable_mosaic.version = 11 : i64} {
  func.func @_tv_kernel(%arg0: i32, %arg1: memref<8x16x16xf32, #tpu.memory_space<vmem>>, %arg2: memref<1x8x128xf32, #tpu.memory_space<vmem>>, %arg3: memref<1x8x128xf32, #tpu.memory_space<vmem>>) attributes {dimension_semantics = [#tpu.dimension_semantics<parallel>], iteration_bounds = array<i64: 1>, scalar_prefetch = 0 : i64, scratch_operands = 0 : i64, tpu.core_type = #tpu.core_type<tc>, window_params = [{transform_indices = @transform_0, window_bounds = array<i64: 8, 16, 16>}, {transform_indices = @transform_1, window_bounds = array<i64: 1, 8, 128>}, {transform_indices = @transform_2, window_bounds = array<i64: 1, 8, 128>}]} {
    %c0 = arith.constant 0 : index
    %c0_0 = arith.constant 0 : index
    %c0_1 = arith.constant 0 : index
    %0 = vector.load %arg1[%c0, %c0_0, %c0_1] : memref<8x16x16xf32, #tpu.memory_space<vmem>>, vector<8x16x16xf32>
    %1 = vector.extract_strided_slice %0 {offsets = [0, 1, 0], sizes = [8, 15, 16], strides = [1, 1, 1]} : vector<8x16x16xf32> to vector<8x15x16xf32>
    %2 = vector.extract_strided_slice %0 {offsets = [0, 0, 0], sizes = [8, 15, 16], strides = [1, 1, 1]} : vector<8x16x16xf32> to vector<8x15x16xf32>
    %3 = arith.subf %1, %2 : vector<8x15x16xf32>
    %4 = arith.mulf %3, %3 : vector<8x15x16xf32>
    %5 = vector.shape_cast %4 : vector<8x15x16xf32> to vector<1x8x15x16xf32>
    %cst = arith.constant dense<0.000000e+00> : vector<1xf32>
    %6 = vector.multi_reduction <add>, %5, %cst [1, 2, 3] : vector<1x8x15x16xf32> to vector<1xf32>
    %7 = vector.shape_cast %6 : vector<1xf32> to vector<1x1x1x1xf32>
    %8 = vector.extract %7[0, 0, 0, 0] : f32 from vector<1x1x1x1xf32>
    %9 = vector.extract_strided_slice %0 {offsets = [0, 0, 1], sizes = [8, 16, 15], strides = [1, 1, 1]} : vector<8x16x16xf32> to vector<8x16x15xf32>
    %10 = vector.extract_strided_slice %0 {offsets = [0, 0, 0], sizes = [8, 16, 15], strides = [1, 1, 1]} : vector<8x16x16xf32> to vector<8x16x15xf32>
    %11 = arith.subf %9, %10 : vector<8x16x15xf32>
    %12 = arith.mulf %11, %11 : vector<8x16x15xf32>
    %13 = vector.shape_cast %12 : vector<8x16x15xf32> to vector<1x8x16x15xf32>
    %cst_2 = arith.constant dense<0.000000e+00> : vector<1xf32>
    %14 = vector.multi_reduction <add>, %13, %cst_2 [1, 2, 3] : vector<1x8x16x15xf32> to vector<1xf32>
    %15 = vector.shape_cast %14 : vector<1xf32> to vector<1x1x1x1xf32>
    %16 = vector.extract %15[0, 0, 0, 0] : f32 from vector<1x1x1x1xf32>
    %17 = vector.broadcast %8 : f32 to vector<1x8x128xf32>
    %c0_3 = arith.constant 0 : index
    %c0_4 = arith.constant 0 : index
    %c0_5 = arith.constant 0 : index
    %18 = vector.load %arg2[%c0_3, %c0_4, %c0_5] : memref<1x8x128xf32, #tpu.memory_space<vmem>>, vector<1x8x128xf32>
    tpu.vector_store %arg2[%c0_3, %c0_4, %c0_5], %17 {strides = array<i32>} : memref<1x8x128xf32, #tpu.memory_space<vmem>>, vector<1x8x128xf32>,
    %19 = vector.broadcast %16 : f32 to vector<1x8x128xf32>
    %c0_6 = arith.constant 0 : index
    %c0_7 = arith.constant 0 : index
    %c0_8 = arith.constant 0 : index
    %20 = vector.load %arg3[%c0_6, %c0_7, %c0_8] : memref<1x8x128xf32, #tpu.memory_space<vmem>>, vector<1x8x128xf32>
    tpu.vector_store %arg3[%c0_6, %c0_7, %c0_8], %19 {strides = array<i32>} : memref<1x8x128xf32, #tpu.memory_space<vmem>>, vector<1x8x128xf32>,
    return
  }
  func.func @transform_0(%arg0: i32) -> (i32, i32, i32) {
    %c0_i32 = arith.constant 0 : i32
    %c0_i32_0 = arith.constant 0 : i32
    %c0_i32_1 = arith.constant 0 : i32
    return %arg0, %c0_i32, %c0_i32_0 : i32, i32, i32
  }
  func.func @transform_1(%arg0: i32) -> (i32, i32, i32) {
    %c0_i32 = arith.constant 0 : i32
    %c0_i32_0 = arith.constant 0 : i32
    %c0_i32_1 = arith.constant 0 : i32
    return %arg0, %c0_i32, %c0_i32_0 : i32, i32, i32
  }
  func.func @transform_2(%arg0: i32) -> (i32, i32, i32) {
    %c0_i32 = arith.constant 0 : i32
    %c0_i32_0 = arith.constant 0 : i32
    %c0_i32_1 = arith.constant 0 : i32
    return %arg0, %c0_i32, %c0_i32_0 : i32, i32, i32
  }
}

</mosaic_0001>

<bundles_post_ra>
// kernel: tpu_custom_call.1
= control target key start
LH: loop header
LB: loop body
LE: loop exit
PB: predicated region body
PF: predicated region fallthrough
CT: control target
= control target key end

     0   :  { %8 = vsyncpa [#allocation3], 0  ;;  %s749_s0 = inlined_call_operand.hbm [shape: f32[8,16,16], index: 0, kind: input, shape index: {}]   ;;  %s750_s1 = inlined_call_operand.hbm [shape: f32[1,8,128], index: 1, kind: output, shape index: {0}]   ;;  %s751_s2 = inlined_call_operand.hbm [shape: f32[1,8,128], index: 2, kind: output, shape index: {1}]  }
   0x1   :  { %9 = vsyncpa [#allocation4], 0 }
   0x2   :  { %10 = vsyncpa [#allocation7], 0  ;;  %s531_s9 = smov [#allocation2]   ;;  %s459_s13 = scalar_lea.hbm %s749_s0, 2048 }
   0x3   :  { %s16_s10 = sshll.u32 %s531_s9, 4  ;;  %p460_p0 = scmp.ne.s32.totalorder %s749_s0, %s459_s13  ;;  %s17_s10 = int_to_ptr.vmem [resolvable:$true] %s16_s10 }
   0x4   :  { %p463_p1 = scmp.lt.u32.totalorder %s459_s13, %s749_s0 }
   0x6   :  { %p465_p2 = pnand %p463_p1, %p460_p0 }
   0x8   :  { %468 = shalt.err (!%p465_p2)
}
   0x9   :  { %s469_s18 = scalar_lea.vmem %s17_s10, 2048  ;;  %p474_p4 = scmp.lt.s32.totalorder %s17_s10, %s17_s10 }
   0xa   :  { %p470_p3 = scmp.ne.s32.totalorder %s17_s10, %s469_s18  ;;  %p475_p5 = scmp.lt.s32.totalorder %s469_s18, %s469_s18 }
   0xc   :  { %p476_p6 = por %p475_p5, %p474_p4 }
   0xe   :  { %p477_p7 = pnand %p476_p6, %p470_p3 }
  0x10   :  { %480 = shalt.err (!%p477_p7)
}
  0x11   :  { %s532_s19 = smov 128   ;;  %s533_s20 = smov 8  }
  0x12   :  { %22 = dma.hbm_to_vmem [thread:$0]  %s749_s0, 2048, %s17_s10, [#allocation3], %s532_s19, %s532_s19, %s533_s20  }
  0x13   :  { %525 = dma.done.wait [#allocation3], 2048  }
  0x14   :  { %526 = vsyncadd [#allocation3], 4294965248  ;;  %v565_v0 = vld [vmem:[#allocation2] sm:$0xff]  ;;  %v567_v1 = vld [vmem:[#allocation2 + $0x10] sm:$0xff]  ;;  %s534_s23 = smov 1   ;;  %vm58_vm0 = vcmask 1040384  }
  0x15   :  { %230 = vrot.lane.b32.xlu0 %v565_v0, %s534_s23  ;;  %234 = vrot.lane.b32.xlu1 %v567_v1, %s534_s23  ;;  %v571_v2 = vld [vmem:[#allocation2 + $0x8] sm:$0xff]  ;;  %v573_v3 = vld [vmem:[#allocation2 + $0x18] sm:$0xff]  ;;  %v577_v4 = vld [vmem:[#allocation2 + $0x20] sm:$0xff]  ;;  %v59_v16 = vrot.slane %v565_v0, 7  ;;  %v62_v18 = vrot.slane %v567_v1, 7  ;;  %vm147_vm1 = vcmask 1046528  }
  0x16   :  { %v579_v5 = vld [vmem:[#allocation2 + $0x28] sm:$0xff]  ;;  %v583_v6 = vld [vmem:[#allocation2 + $0x30] sm:$0xff]  ;;  %v585_v7 = vld [vmem:[#allocation2 + $0x38] sm:$0xff]  ;;  %v60_v17 = vrot.slane %v571_v2, 7  ;;  %v63_v20 = vrot.slane %v573_v3, 7  ;;  %v65_v28 = vrot.slane %v577_v4, 7 }
  0x17   :  { %v589_v8 = vld [vmem:[#allocation2 + $0x40] sm:$0xff]  ;;  %v591_v9 = vld [vmem:[#allocation2 + $0x48] sm:$0xff]  ;;  %v595_v10 = vld [vmem:[#allocation2 + $0x50] sm:$0xff]  ;;  %v99_v21 = vsub.f32 %v565_v0, %v59_v16  ;;  %v101_v25 = vsub.f32 %v567_v1, %v62_v18  ;;  %v66_v29 = vrot.slane %v579_v5, 7  ;;  %vm188_vm2 = vcmask 130048   ;;  %s535_s0 = smov 127  }
  0x18   :  { %v597_v11 = vld [vmem:[#allocation2 + $0x58] sm:$0xff]  ;;  %v601_v12 = vld [vmem:[#allocation2 + $0x60] sm:$0xff]  ;;  %v603_v13 = vld [vmem:[#allocation2 + $0x68] sm:$0xff]  ;;  %v61_v19 = vsel %vm58_vm0, %v59_v16, %v60_v17  ;;  %v64_v23 = vsel %vm58_vm0, %v62_v18, %v63_v20  ;;  %vm190_vm3 = vcmask 129024   ;;  %v103_v35 = vsub.f32 %v577_v4, %v65_v28  ;;  %s536_s24 = smov [#allocation5]  }
  0x19   :  { %232 = vrot.lane.b32.xlu0 %v571_v2, %s534_s23  ;;  %236 = vrot.lane.b32.xlu1 %v573_v3, %s534_s23  ;;  %v607_v14 = vld [vmem:[#allocation2 + $0x70] sm:$0xff]  ;;  %v609_v15 = vld [vmem:[#allocation2 + $0x78] sm:$0xff]  ;;  %v100_v22 = vsub.f32 %v571_v2, %v61_v19  ;;  %v115_v24 = vmul.f32 %v99_v21, %v99_v21  ;;  %v102_v27 = vsub.f32 %v573_v3, %v64_v23  ;;  %v68_v40 = vrot.slane %v583_v6, 7  ;;  %s425_s25 = sshll.u32 %s536_s24, 4  ;;  %s426_s25 = int_to_ptr.vmem [resolvable:$true] %s425_s25 }
  0x1a   :  { %v117_v31 = vmul.f32 %v101_v25, %v101_v25  ;;  %v67_v34 = vsel %vm58_vm0, %v65_v28, %v66_v29  ;;  %v69_v41 = vrot.slane %v585_v7, 7  ;;  %v119_v49 = vmul.f32 %v103_v35, %v103_v35  ;;  %s481_s27 = scalar_lea.vmem %s426_s25, 128  ;;  %p486_p9 = scmp.lt.s32.totalorder %s426_s25, %s426_s25 }
  0x1b   :  { %v116_v26 = vmul.f32 %v100_v22, %v100_v22  ;;  %v148_v30 = vrot.slane %v115_v24, 1  ;;  %v118_v33 = vmul.f32 %v102_v27, %v102_v27  ;;  %v104_v39 = vsub.f32 %v579_v5, %v67_v34  ;;  %p482_p8 = scmp.ne.s32.totalorder %s426_s25, %s481_s27  ;;  %p487_p10 = scmp.lt.s32.totalorder %s481_s27, %s481_s27 }
  0x1c   :  { %v151_v36 = vrot.slane %v117_v31, 1  ;;  %v70_v51 = vsel %vm58_vm0, %v68_v40, %v69_v41  ;;  %v154_v60 = vrot.slane %v119_v49, 1  ;;  %v105_v62 = vsub.f32 %v583_v6, %v68_v40 }
  0x1d   :  { %238 = vrot.lane.b32.xlu0 %v577_v4, %s534_s23  ;;  %240 = vrot.lane.b32.xlu1 %v579_v5, %s534_s23  ;;  %v149_v32 = vrot.slane %v116_v26, 1  ;;  %v152_v38 = vrot.slane %v118_v33, 1  ;;  %v120_v50 = vmul.f32 %v104_v39, %v104_v39  ;;  %v106_v63 = vsub.f32 %v585_v7, %v70_v51  ;;  %p488_p11 = por %p487_p10, %p486_p9 }
  0x1e   :  { %v121_v23 = vmul.f32 %v105_v62, %v105_v62  ;;  %vm374_vm4 = vcmask 121856  }
  0x1f   :  { %v150_v37 = vsel %vm147_vm1, %v148_v30, %v149_v32  ;;  %v191_v45 = vsel %vm190_vm3, %v149_v32, 0.0  ;;  %v153_v48 = vsel %vm147_vm1, %v151_v36, %v152_v38  ;;  %v155_v61 = vrot.slane %v120_v50, 1  ;;  %p489_p12 = pnand %p488_p11, %p482_p8 }
  0x20   :  { %v189_v44 = vsel %vm188_vm2, %v150_v37, 0.0  ;;  %v193_v56 = vsel %vm188_vm2, %v153_v48, 0.0  ;;  %v122_v24 = vmul.f32 %v106_v63, %v106_v63  ;;  %v74_v36 = vrot.slane %v595_v10, 7 }
  0x21   :  { %242 = vrot.lane.b32.xlu0 %v583_v6, %s534_s23  ;;  %244 = vrot.lane.b32.xlu1 %v585_v7, %s534_s23  ;;  %v192_v53 = vadd.f32 %v191_v45, %v189_v44  ;;  %v156_v22 = vsel %vm147_vm1, %v154_v60, %v155_v61  ;;  %v75_v37 = vrot.slane %v597_v11, 7 }
  0x22   :  { %v197_v30 = vsel %vm188_vm2, %v156_v22, 0.0  ;;  %v158_v33 = vrot.slane %v122_v24, 1 }
  0x23   :  { %v194_v17 = vadd.f32 %v193_v56, %v192_v53  ;;  %v109_v56 = vsub.f32 %v595_v10, %v74_v36 }
  0x25   :  { %246 = vrot.lane.b32.xlu0 %v589_v8, %s534_s23  ;;  %248 = vrot.lane.b32.xlu1 %v591_v9, %s534_s23 }
  0x29   :  { %250 = vrot.lane.b32.xlu0 %v595_v10, %s534_s23  ;;  %252 = vrot.lane.b32.xlu1 %v597_v11, %s534_s23 }
  0x2d   :  { %254 = vrot.lane.b32.xlu0 %v601_v12, %s534_s23  ;;  %256 = vrot.lane.b32.xlu1 %v603_v13, %s534_s23 }
  0x31   :  { %258 = vrot.lane.b32.xlu0 %v607_v14, %s534_s23  ;;  %260 = vrot.lane.b32.xlu1 %v609_v15, %s534_s23 }
  0x87   :  { %v231_v42 = vpop.permute.xlu0 %230  ;;  %v235_v43 = vpop.permute.xlu1 %234 }
  0x88   :  { %v278_v46 = vsub.f32 %v565_v0, %v231_v42  ;;  %v280_v47 = vsub.f32 %v567_v1, %v235_v43  ;;  %v71_v0 = vrot.slane %v589_v8, 7  ;;  %v72_v1 = vrot.slane %v591_v9, 7 }
  0x8a   :  { %v294_v52 = vmul.f32 %v278_v46, %v278_v46  ;;  %v296_v57 = vmul.f32 %v280_v47, %v280_v47  ;;  %v73_v25 = vsel %vm58_vm0, %v71_v0, %v72_v1  ;;  %v107_v34 = vsub.f32 %v589_v8, %v71_v0 }
  0x8b   :  { %v233_v54 = vpop.permute.xlu0 %232  ;;  %v237_v55 = vpop.permute.xlu1 %236  ;;  %v108_v35 = vsub.f32 %v591_v9, %v73_v25  ;;  %v76_v47 = vsel %vm58_vm0, %v74_v36, %v75_v37  ;;  %v203_v0 = vsel %vm190_vm3, %v158_v33, 0.0 }
  0x8c   :  { %v279_v58 = vsub.f32 %v571_v2, %v233_v54  ;;  %326 = vrot.lane.b32.xlu0 %v294_v52, %s535_s0  ;;  %v281_v59 = vsub.f32 %v573_v3, %v237_v55  ;;  %v195_v2 = vsel %vm190_vm3, %v152_v38, 0.0  ;;  %v123_v45 = vmul.f32 %v107_v34, %v107_v34 }
  0x8d   :  { %v196_v27 = vadd.f32 %v195_v2, %v194_v17  ;;  %v124_v46 = vmul.f32 %v108_v35, %v108_v35  ;;  %v125_v17 = vmul.f32 %v109_v56, %v109_v56 }
  0x8e   :  { %v295_v16 = vmul.f32 %v279_v58, %v279_v58  ;;  %v297_v20 = vmul.f32 %v281_v59, %v281_v59  ;;  %v160_v54 = vrot.slane %v123_v45, 1  ;;  %v77_v58 = vrot.slane %v601_v12, 7 }
  0x8f   :  { %v239_v18 = vpop.permute.xlu0 %238  ;;  %v241_v19 = vpop.permute.xlu1 %240  ;;  %v198_v39 = vadd.f32 %v197_v30, %v196_v27  ;;  %v161_v55 = vrot.slane %v124_v46, 1  ;;  %v78_v59 = vrot.slane %v603_v13, 7  ;;  %v80_v30 = vrot.slane %v607_v14, 7 }
  0x90   :  { %330 = vrot.lane.b32.xlu0 %v296_v57, %s535_s0  ;;  %328 = vrot.lane.b32.xlu1 %v295_v16, %s535_s0  ;;  %v282_v3 = vsub.f32 %v577_v4, %v239_v18  ;;  %v283_v21 = vsub.f32 %v579_v5, %v241_v19  ;;  %v157_v5 = vrot.slane %v121_v23, 1  ;;  %v110_v57 = vsub.f32 %v597_v11, %v76_v47 }
  0x91   :  { %v79_v19 = vsel %vm58_vm0, %v77_v58, %v78_v59 }
  0x92   :  { %v298_v26 = vmul.f32 %v282_v3, %v282_v3  ;;  %v299_v31 = vmul.f32 %v283_v21, %v283_v21  ;;  %v159_v44 = vsel %vm147_vm1, %v157_v5, %v158_v33  ;;  %v126_v18 = vmul.f32 %v110_v57, %v110_v57 }
  0x93   :  { %v243_v28 = vpop.permute.xlu0 %242  ;;  %v245_v29 = vpop.permute.xlu1 %244  ;;  %v201_v52 = vsel %vm188_vm2, %v159_v44, 0.0  ;;  %v207_v5 = vsel %vm190_vm3, %v161_v55, 0.0 }
  0x94   :  { %332 = vrot.lane.b32.xlu1 %v297_v20, %s535_s0  ;;  %v284_v32 = vsub.f32 %v583_v6, %v243_v28  ;;  %334 = vrot.lane.b32.xlu0 %v298_v26, %s535_s0  ;;  %v285_v4 = vsub.f32 %v585_v7, %v245_v29  ;;  %v199_v6 = vsel %vm190_vm3, %v155_v61, 0.0  ;;  %v163_v26 = vrot.slane %v125_v17, 1 }
  0x95   :  { %v200_v49 = vadd.f32 %v199_v6, %v198_v39  ;;  %v164_v27 = vrot.slane %v126_v18, 1  ;;  %v111_v28 = vsub.f32 %v601_v12, %v77_v58  ;;  %v112_v29 = vsub.f32 %v603_v13, %v79_v19 }
  0x96   :  { %v300_v38 = vmul.f32 %v284_v32, %v284_v32  ;;  %v301_v42 = vmul.f32 %v285_v4, %v285_v4  ;;  %v113_v39 = vsub.f32 %v607_v14, %v80_v30 }
  0x97   :  { %v247_v40 = vpop.permute.xlu0 %246  ;;  %v249_v41 = vpop.permute.xlu1 %248  ;;  %v202_v61 = vadd.f32 %v201_v52, %v200_v49  ;;  %v165_v34 = vsel %vm147_vm1, %v163_v26, %v164_v27  ;;  %v127_v35 = vmul.f32 %v111_v28, %v111_v28  ;;  %v128_v36 = vmul.f32 %v112_v29, %v112_v29 }
  0x98   :  { %336 = vrot.lane.b32.xlu1 %v299_v31, %s535_s0  ;;  %v286_v7 = vsub.f32 %v589_v8, %v247_v40  ;;  %338 = vrot.lane.b32.xlu0 %v300_v38, %s535_s0  ;;  %v287_v43 = vsub.f32 %v591_v9, %v249_v41  ;;  %v81_v31 = vrot.slane %v609_v15, 7  ;;  %v209_v37 = vsel %vm188_vm2, %v165_v34, 0.0 }
  0x99   :  { %v204_v20 = vadd.f32 %v203_v0, %v202_v61  ;;  %v166_v38 = vrot.slane %v127_v35, 1  ;;  %v167_v41 = vrot.slane %v128_v36, 1 }
  0x9a   :  { %v302_v48 = vmul.f32 %v286_v7, %v286_v7  ;;  %v303_v53 = vmul.f32 %v287_v43, %v287_v43  ;;  %v129_v7 = vmul.f32 %v113_v39, %v113_v39 }
  0x9b   :  { %v251_v50 = vpop.permute.xlu0 %250  ;;  %v253_v51 = vpop.permute.xlu1 %252  ;;  %v168_v44 = vsel %vm147_vm1, %v166_v38, %v167_v41 }
  0x9c   :  { %340 = vrot.lane.b32.xlu1 %v301_v42, %s535_s0  ;;  %v288_v8 = vsub.f32 %v595_v10, %v251_v50  ;;  %342 = vrot.lane.b32.xlu0 %v302_v48, %s535_s0  ;;  %v289_v9 = vsub.f32 %v597_v11, %v253_v51  ;;  %v162_v11 = vsel %vm147_vm1, %v160_v54, %v161_v55  ;;  %v211_v42 = vsel %vm190_vm3, %v164_v27, 0.0 }
  0x9d   :  { %v205_v22 = vsel %vm188_vm2, %v162_v11, 0.0  ;;  %v213_v46 = vsel %vm188_vm2, %v168_v44, 0.0  ;;  %v169_v47 = vrot.slane %v129_v7, 1  ;;  %v215_v50 = vsel %vm190_vm3, %v167_v41, 0.0 }
  0x9e   :  { %v304_v60 = vmul.f32 %v288_v8, %v288_v8  ;;  %v305_v1 = vmul.f32 %v289_v9, %v289_v9  ;;  %v206_v4 = vadd.f32 %v205_v22, %v204_v20 }
  0x9f   :  { %v255_v62 = vpop.permute.xlu0 %254  ;;  %v257_v63 = vpop.permute.xlu1 %256 }
  0xa0   :  { %344 = vrot.lane.b32.xlu1 %v303_v53, %s535_s0  ;;  %v290_v16 = vsub.f32 %v601_v12, %v255_v62  ;;  %346 = vrot.lane.b32.xlu0 %v304_v60, %s535_s0  ;;  %v291_v10 = vsub.f32 %v603_v13, %v257_v63  ;;  %v82_v12 = vsel %vm58_vm0, %v80_v30, %v81_v31 }
  0xa1   :  { %v208_v13 = vadd.f32 %v207_v5, %v206_v4  ;;  %v114_v40 = vsub.f32 %v609_v15, %v82_v12 }
  0xa2   :  { %v306_v2 = vmul.f32 %v290_v16, %v290_v16  ;;  %v307_v23 = vmul.f32 %v291_v10, %v291_v10 }
  0xa3   :  { %v259_v3 = vpop.permute.xlu0 %258  ;;  %v261_v21 = vpop.permute.xlu1 %260  ;;  %v210_v6 = vadd.f32 %v209_v37, %v208_v13  ;;  %v130_v43 = vmul.f32 %v114_v40, %v114_v40 }
  0xa4   :  { %348 = vrot.lane.b32.xlu1 %v305_v1, %s535_s0  ;;  %v292_v24 = vsub.f32 %v607_v14, %v259_v3  ;;  %350 = vrot.lane.b32.xlu0 %v306_v2, %s535_s0  ;;  %v293_v25 = vsub.f32 %v609_v15, %v261_v21 }
  0xa5   :  { %v212_v45 = vadd.f32 %v211_v42, %v210_v6  ;;  %v170_v48 = vrot.slane %v130_v43, 1 }
  0xa6   :  { %v308_v32 = vmul.f32 %v292_v24, %v292_v24  ;;  %v309_v33 = vmul.f32 %v293_v25, %v293_v25 }
  0xa7   :  { %v214_v49 = vadd.f32 %v213_v46, %v212_v45  ;;  %v171_v14 = vsel %vm147_vm1, %v169_v47, %v170_v48  ;;  %v219_v53 = vsel %vm190_vm3, %v170_v48, 0.0 }
  0xa8   :  { %352 = vrot.lane.b32.xlu1 %v307_v23, %s535_s0  ;;  %354 = vrot.lane.b32.xlu0 %v308_v32, %s535_s0  ;;  %v217_v15 = vsel %vm188_vm2, %v171_v14, 0.0 }
  0xa9   :  { %v216_v51 = vadd.f32 %v215_v50, %v214_v49 }
  0xab   :  { %v218_v52 = vadd.f32 %v217_v15, %v216_v51 }
  0xac   :  { %356 = vrot.lane.b32.xlu1 %v309_v33, %s535_s0 }
  0xad   :  { %v220_v8 = vadd.f32 %v219_v53, %v218_v52 }
  0xc7   :  { %221 = vadd.xlane.f32.xlu0 %v220_v8 }
  0xfe   :  { %v327_v9 = vpop.permute.xlu0 %326 }
  0xff   :  { %v375_v56 = vsel %vm374_vm4, %v327_v9, 0.0 }
 0x102   :  { %v329_v54 = vpop.permute.xlu1 %328  ;;  %v331_v55 = vpop.permute.xlu0 %330 }
 0x103   :  { %v376_v57 = vsel %vm374_vm4, %v329_v54, 0.0  ;;  %v378_v59 = vsel %vm374_vm4, %v331_v55, 0.0 }
 0x104   :  { %v377_v58 = vadd.f32 %v376_v57, %v375_v56 }
 0x106   :  { %v379_v60 = vadd.f32 %v378_v59, %v377_v58  ;;  %v333_v61 = vpop.permute.xlu1 %332  ;;  %v335_v62 = vpop.permute.xlu0 %334 }
 0x107   :  { %v380_v63 = vsel %vm374_vm4, %v333_v61, 0.0  ;;  %v382_v0 = vsel %vm374_vm4, %v335_v62, 0.0 }
 0x108   :  { %v381_v1 = vadd.f32 %v380_v63, %v379_v60 }
 0x10a   :  { %v383_v16 = vadd.f32 %v382_v0, %v381_v1  ;;  %v337_v10 = vpop.permute.xlu1 %336  ;;  %v339_v11 = vpop.permute.xlu0 %338 }
 0x10b   :  { %v384_v17 = vsel %vm374_vm4, %v337_v10, 0.0  ;;  %v386_v18 = vsel %vm374_vm4, %v339_v11, 0.0 }
 0x10c   :  { %v385_v19 = vadd.f32 %v384_v17, %v383_v16 }
 0x10e   :  { %v387_v2 = vadd.f32 %v386_v18, %v385_v19  ;;  %v341_v20 = vpop.permute.xlu1 %340  ;;  %v343_v3 = vpop.permute.xlu0 %342 }
 0x10f   :  { %v388_v21 = vsel %vm374_vm4, %v341_v20, 0.0  ;;  %v390_v22 = vsel %vm374_vm4, %v343_v3, 0.0 }
 0x110   :  { %v389_v23 = vadd.f32 %v388_v21, %v387_v2 }
 0x112   :  { %v391_v24 = vadd.f32 %v390_v22, %v389_v23  ;;  %v345_v25 = vpop.permute.xlu1 %344  ;;  %v347_v26 = vpop.permute.xlu0 %346 }
 0x113   :  { %v392_v27 = vsel %vm374_vm4, %v345_v25, 0.0  ;;  %v394_v28 = vsel %vm374_vm4, %v347_v26, 0.0 }
 0x114   :  { %v393_v29 = vadd.f32 %v392_v27, %v391_v24 }
 0x116   :  { %v395_v30 = vadd.f32 %v394_v28, %v393_v29  ;;  %v349_v31 = vpop.permute.xlu1 %348  ;;  %v351_v32 = vpop.permute.xlu0 %350 }
 0x117   :  { %v396_v4 = vsel %vm374_vm4, %v349_v31, 0.0  ;;  %v398_v5 = vsel %vm374_vm4, %v351_v32, 0.0 }
 0x118   :  { %v397_v33 = vadd.f32 %v396_v4, %v395_v30 }
 0x11a   :  { %v399_v34 = vadd.f32 %v398_v5, %v397_v33  ;;  %v353_v35 = vpop.permute.xlu1 %352  ;;  %v355_v36 = vpop.permute.xlu0 %354 }
 0x11b   :  { %v400_v12 = vsel %vm374_vm4, %v353_v35, 0.0  ;;  %v402_v13 = vsel %vm374_vm4, %v355_v36, 0.0 }
 0x11c   :  { %v401_v37 = vadd.f32 %v400_v12, %v399_v34 }
 0x11e   :  { %v403_v38 = vadd.f32 %v402_v13, %v401_v37  ;;  %v357_v39 = vpop.permute.xlu1 %356 }
 0x11f   :  { %v404_v40 = vsel %vm374_vm4, %v357_v39, 0.0 }
 0x120   :  { %v405_v41 = vadd.f32 %v404_v40, %v403_v38 }
 0x122   :  { %406 = vadd.xlane.f32.xlu1 %v405_v41 }
 0x154   :  { %v222_v6 = vpop.xlane.xlu0 %221 }
 0x155   :  { %v223_v42 = vrot.slane %v222_v6, 4 }
 0x157   :  { %v224_v7 = vadd.f32 %v223_v42, %v222_v6 }
 0x159   :  { %v225_v43 = vrot.slane %v224_v7, 2 }
 0x15b   :  { %v226_v44 = vadd.f32 %v225_v43, %v224_v7 }
 0x15d   :  { %v227_v45 = vrot.slane %v226_v44, 1 }
 0x15f   :  { %v228_v46 = vadd.f32 %v227_v45, %v226_v44 }
 0x161   :  { %448 = vpush %v228_v46 }
 0x192   :  { %s449_s26 = spop %448 }
 0x193   :  { %v415_v47 = vstv %s449_s26 }
 0x194   :  { %416 = vst [vmem:[#allocation5] sm:$0xff] %v415_v47 }
 0x195   :  { %492 = shalt.err (!%p489_p12)
}
 0x196   :  { %s493_s30 = scalar_lea.hbm %s750_s1, 128 }
 0x197   :  { %p494_p13 = scmp.ne.s32.totalorder %s750_s1, %s493_s30  ;;  %p497_p0 = scmp.lt.u32.totalorder %s493_s30, %s750_s1 }
 0x199   :  { %p499_p1 = pnand %p497_p0, %p494_p13 }
 0x19b   :  { %502 = shalt.err (!%p499_p1)
}
 0x19c   :  { %428 = dma.vmem_to_hbm [thread:$0]  %s426_s25, 128, %s750_s1, [#allocation4]  }
 0x19d   :  { %s537_s9 = smov [#allocation6]  }
 0x19e   :  { %s435_s10 = sshll.u32 %s537_s9, 4  ;;  %s436_s10 = int_to_ptr.vmem [resolvable:$true] %s435_s10 }
 0x19f   :  { %s503_s12 = scalar_lea.vmem %s436_s10, 128  ;;  %p508_p3 = scmp.lt.s32.totalorder %s436_s10, %s436_s10 }
 0x1a0   :  { %p504_p2 = scmp.ne.s32.totalorder %s436_s10, %s503_s12  ;;  %p509_p4 = scmp.lt.s32.totalorder %s503_s12, %s503_s12 }
 0x1a2   :  { %p510_p5 = por %p509_p4, %p508_p3 }
 0x1a4   :  { %p511_p6 = pnand %p510_p5, %p504_p2 }
 0x1af   :  { %v407_v48 = vpop.xlane.xlu1 %406 }
 0x1b0   :  { %v408_v49 = vrot.slane %v407_v48, 4 }
 0x1b2   :  { %v409_v50 = vadd.f32 %v408_v49, %v407_v48 }
 0x1b4   :  { %v410_v14 = vrot.slane %v409_v50, 2 }
 0x1b6   :  { %v411_v51 = vadd.f32 %v410_v14, %v409_v50 }
 0x1b8   :  { %v412_v15 = vrot.slane %v411_v51, 1 }
 0x1ba   :  { %v413_v52 = vadd.f32 %v412_v15, %v411_v51 }
 0x1bc   :  { %450 = vpush %v413_v52 }
 0x1ed   :  { %s451_s11 = spop %450 }
 0x1ee   :  { %v417_v53 = vstv %s451_s11 }
 0x1ef   :  { %418 = vst [vmem:[#allocation6] sm:$0xff] %v417_v53 }
 0x1f0   :  { %514 = shalt.err (!%p511_p6)
}
 0x1f1   :  { %s515_s14 = scalar_lea.hbm %s751_s2, 128 }
 0x1f2   :  { %p516_p7 = scmp.ne.s32.totalorder %s751_s2, %s515_s14  ;;  %p519_p8 = scmp.lt.u32.totalorder %s515_s14, %s751_s2 }
 0x1f4   :  { %p521_p9 = pnand %p519_p8, %p516_p7 }
 0x1f6   :  { %524 = shalt.err (!%p521_p9)
}
 0x1f7   :  { %438 = dma.vmem_to_hbm [thread:$0]  %s436_s10, 128, %s751_s2, [#allocation7]  }
 0x1f8   :  { %527 = dma.done.wait [#allocation4], 128  }
 0x1f9   :  { %528 = vsyncadd [#allocation4], 4294967168 }
 0x1fa   :  { %529 = dma.done.wait [#allocation7], 128  }
 0x1fb   :  { %530 = vsyncadd [#allocation7], 4294967168 }
 0x1fc   :  { %445 = vsyncpa [#allocation3], 1 }
 0x1fd   :  { %446 = vsyncpa [#allocation4], 1 }
 0x1fe   :  { %447 = vsyncpa [#allocation7], 1 }

</bundles_post_ra>
